<compile_context>
chip_gen: v7x
topology: tpu7x:2x2x1
jax: 0.10.0
libtpu: 0.0.40
codegen_flags: <defaults>
</compile_context>

<pallas_src>
import jax
import jax.numpy as jnp
from jax.experimental import pallas as pl
from jax.experimental.pallas import tpu as pltpu


def _cbam_kernel(x_ref, w1_ref, w2_ref, bnb_ref, band_a_ref, band_b_ref, o_ref):
    # x_ref: (B, C, HW) f32; w1: (C, Cr); w2: (Cr, C) (BN scale folded);
    # bnb: (1, C) BN shift; band_a/band_b: (HW, HW) banded 7x7-conv matrices.
    B, C, HW = x_ref.shape
    x = x_ref[...]                                                   # (B, C, HW)

    # ---------------- SEBlock (VPU: broadcast-mul + reductions) -------------
    avg = jnp.sum(x, axis=2) * (1.0 / HW)                            # (B, C)
    # 1x1 conv C->Cr + ReLU.
    h = jnp.maximum(
        jnp.sum(avg[:, :, None] * w1_ref[...][None, :, :], axis=1), 0.0)      # (B, Cr)
    # 1x1 conv Cr->C with BatchNorm scale folded in, plus folded BN shift.
    se = jnp.sum(h[:, :, None] * w2_ref[...][None, :, :], axis=1) + bnb_ref[...]  # (B, C)
    attn = jax.nn.sigmoid(se)                                        # (B, C)
    x_se = x * attn[:, :, None]                                      # (B, C, HW)

    # ------------- SpatialAttention channel stats (sublane reductions) ------
    avg_map = jnp.sum(x_se, axis=1) * (1.0 / C)                      # (B, HW)
    max_map = jnp.max(x_se, axis=1)                                  # (B, HW)

    # ------------- 7x7 zero-padded conv as two MXU matmuls ------------------
    conv = (jnp.dot(avg_map, band_a_ref[...], preferred_element_type=jnp.float32)
            + jnp.dot(max_map, band_b_ref[...], preferred_element_type=jnp.float32))

    # SpatialAttention returns conv_out * sigmoid(conv_out); dense store.
    o_ref[...] = conv * jax.nn.sigmoid(conv)                         # (B, HW)


def _make_band_matrices(conv_w, H, W):
    """Banded (HW, HW) matrices for the 7x7 'SAME' conv over avg/max maps.

    band[p, q] = weight[p_h - q_h + pad, p_w - q_w + pad] when |dh|,|dw| <= pad,
    else 0.  Zero-padding validity is implicit because p only ranges over real
    image positions.  Then conv[b, q] = sum_p map[b, p] * band[p, q].
    """
    ks = conv_w.shape[-1]
    pad = ks // 2
    HW = H * W
    pos = jnp.arange(HW, dtype=jnp.int32)
    ph, pw = pos // W, pos % W
    dh = ph[:, None] - ph[None, :]                       # (HW, HW): rows=p, cols=q
    dw = pw[:, None] - pw[None, :]
    valid = (jnp.abs(dh) <= pad) & (jnp.abs(dw) <= pad)
    ih = jnp.clip(dh + pad, 0, ks - 1)
    iw = jnp.clip(dw + pad, 0, ks - 1)
    band_a = jnp.where(valid, conv_w[0, 0][ih, iw], 0.0).astype(jnp.float32)
    band_b = jnp.where(valid, conv_w[0, 1][ih, iw], 0.0).astype(jnp.float32)
    return band_a, band_b


def cbam_forward(x_nchw, params, *, block_b=None):
    """x_nchw: (N, C, H, W) float32 -> (N, 1, H, W) float32 (CBAM.forward)."""
    N, C, H, W = x_nchw.shape
    HW = H * W
    # Free reshape (no transpose): channels on sublanes, H*W on lanes.
    x = x_nchw.reshape(N, C, HW).astype(jnp.float32)

    # SE 1x1-conv weights. PyTorch: fc1 weight (Cr, C), fc2 weight (C, Cr).
    w1 = params["w1"].astype(jnp.float32)                            # (Cr, C)
    w2 = params["w2"].astype(jnp.float32)                            # (C, Cr)
    Cr = w1.shape[0]

    # BatchNorm2d (eval mode): fold scale into the second 1x1 conv.
    # TODO(synk): training-mode BN (batch statistics + running-stat updates) is
    # stateful and not reproduced; eval-mode running-stat semantics are used.
    eps = 1e-5
    scale = (params["bn_gamma"] / jnp.sqrt(params["bn_var"] + eps)).astype(jnp.float32)
    shift = (params["bn_beta"] - params["bn_mean"] * scale).astype(jnp.float32)
    w1_k = w1.T                                                      # (C, Cr)
    w2_k = w2.T * scale[None, :]                                     # (Cr, C)
    bnb = shift.reshape(1, C)                                        # (1, C)

    # Banded 7x7-conv matrices (weights * padding validity folded in).
    band_a, band_b = _make_band_matrices(params["sa_conv"].astype(jnp.float32), H, W)

    # Batch blocking: amortize per-step overhead & fill vreg sublanes.
    # block_b is either the full (small) batch or 32 (a multiple of 8, so the
    # x/out blocks stay sublane-aligned and double-buffered blocks stay ~2 MB).
    if block_b is None:
        block_b = min(N, 32)
    grid_n = pl.cdiv(N, block_b)
    n_pad = grid_n * block_b
    if n_pad != N:
        x = jnp.pad(x, ((0, n_pad - N), (0, 0), (0, 0)))

    out = pl.pallas_call(
        _cbam_kernel,
        out_shape=jax.ShapeDtypeStruct((n_pad, HW), jnp.float32),
        grid=(grid_n,),
        in_specs=[
            pl.BlockSpec((block_b, C, HW), lambda n: (n, 0, 0)),     # x block
            pl.BlockSpec((C, Cr), lambda n: (0, 0)),                 # fc1^T
            pl.BlockSpec((Cr, C), lambda n: (0, 0)),                 # fc2^T * bn_scale
            pl.BlockSpec((1, C), lambda n: (0, 0)),                  # bn shift
            pl.BlockSpec((HW, HW), lambda n: (0, 0)),                # avg band
            pl.BlockSpec((HW, HW), lambda n: (0, 0)),                # max band
        ],
        out_specs=pl.BlockSpec((block_b, HW), lambda n: (n, 0)),     # lane-dense
        compiler_params=pltpu.CompilerParams(
            dimension_semantics=("parallel",)),
    )(x, w1_k, w2_k, bnb, band_a, band_b)

    return out[:N].reshape(N, 1, H, W)                               # free reshape


def _cbam_reference(x, p):
    """Pure-JAX reference of CBAM.forward (eval-mode BN) for validation."""
    eps = 1e-5
    hp = jax.lax.Precision.HIGHEST
    avg = jnp.mean(x, axis=(2, 3), keepdims=True)                    # (N,C,1,1)
    h = jnp.maximum(jnp.einsum("rc,ncij->nrij", p["w1"], avg, precision=hp), 0.0)
    se = jnp.einsum("cr,nrij->ncij", p["w2"], h, precision=hp)
    scale = p["bn_gamma"] / jnp.sqrt(p["bn_var"] + eps)
    shift = p["bn_beta"] - p["bn_mean"] * scale
    attn = jax.nn.sigmoid(se * scale[None, :, None, None] + shift[None, :, None, None])
    xs = x * attn
    avg_c = jnp.mean(xs, axis=1, keepdims=True)
    max_c = jnp.max(xs, axis=1, keepdims=True)
    cat = jnp.concatenate([avg_c, max_c], axis=1)                    # (N,2,H,W)
    conv = jax.lax.conv_general_dilated(
        cat, p["sa_conv"], window_strides=(1, 1), padding="SAME",
        dimension_numbers=("NCHW", "OIHW", "NCHW"), precision=hp)
    return conv * jax.nn.sigmoid(conv)


if __name__ == "__main__":
    key = jax.random.PRNGKey(0)
    N, C, H, W = 2, 32, 16, 16
    reduction, ks = 16, 7
    Cr = C // reduction

    keys = jax.random.split(key, 8)
    x = jax.random.normal(keys[0], (N, C, H, W), dtype=jnp.float32)
    params = {
        # SE fc: Conv2d(C, C//r, 1, bias=False) and Conv2d(C//r, C, 1, bias=False)
        "w1": jax.random.normal(keys[1], (Cr, C), dtype=jnp.float32) * 0.2,
        "w2": jax.random.normal(keys[2], (C, Cr), dtype=jnp.float32) * 0.2,
        # BatchNorm2d(C) parameters + running stats (deterministic synthetic)
        "bn_gamma": jax.random.uniform(keys[3], (C,), jnp.float32, 0.5, 1.5),
        "bn_beta": jax.random.normal(keys[4], (C,), dtype=jnp.float32) * 0.1,
        "bn_mean": jax.random.normal(keys[5], (C,), dtype=jnp.float32) * 0.1,
        "bn_var": jax.random.uniform(keys[6], (C,), jnp.float32, 0.5, 1.5),
        # SpatialAttention: Conv2d(2, 1, 7, padding=3, bias=False)
        "sa_conv": jax.random.normal(keys[7], (1, 2, ks, ks), dtype=jnp.float32) * 0.1,
    }

    out = jax.jit(cbam_forward)(x, params)
    jax.block_until_ready(out)
    assert out.shape == (N, 1, H, W) and out.dtype == jnp.float32

    ref = _cbam_reference(x, params)
    err = float(jnp.max(jnp.abs(out - ref)))
    assert jnp.allclose(out, ref, atol=1e-3, rtol=1e-3), f"max abs err = {err}"
    print("KERNEL_OK")
</pallas_src>

<mosaic_0001>
module attributes {stable_mosaic.version = 11 : i64} {
  func.func @_cbam_kernel(%arg0: i32, %arg1: memref<2x32x256xf32, #tpu.memory_space<vmem>>, %arg2: memref<32x2xf32, #tpu.memory_space<vmem>>, %arg3: memref<2x32xf32, #tpu.memory_space<vmem>>, %arg4: memref<1x32xf32, #tpu.memory_space<vmem>>, %arg5: memref<256x256xf32, #tpu.memory_space<vmem>>, %arg6: memref<256x256xf32, #tpu.memory_space<vmem>>, %arg7: memref<2x256xf32, #tpu.memory_space<vmem>>) attributes {dimension_semantics = [#tpu.dimension_semantics<parallel>], iteration_bounds = array<i64: 1>, scalar_prefetch = 0 : i64, scratch_operands = 0 : i64, tpu.core_type = #tpu.core_type<tc>, window_params = [{transform_indices = @transform_0, window_bounds = array<i64: 2, 32, 256>}, {pipeline_mode = #tpu.pipeline_mode<synchronous>, transform_indices = @transform_1, window_bounds = array<i64: 32, 2>}, {pipeline_mode = #tpu.pipeline_mode<synchronous>, transform_indices = @transform_2, window_bounds = array<i64: 2, 32>}, {pipeline_mode = #tpu.pipeline_mode<synchronous>, transform_indices = @transform_3, window_bounds = array<i64: 1, 32>}, {pipeline_mode = #tpu.pipeline_mode<synchronous>, transform_indices = @transform_4, window_bounds = array<i64: 256, 256>}, {pipeline_mode = #tpu.pipeline_mode<synchronous>, transform_indices = @transform_5, window_bounds = array<i64: 256, 256>}, {transform_indices = @transform_6, window_bounds = array<i64: 2, 256>}]} {
    %c0 = arith.constant 0 : index
    %c0_0 = arith.constant 0 : index
    %c0_1 = arith.constant 0 : index
    %0 = vector.load %arg1[%c0, %c0_0, %c0_1] : memref<2x32x256xf32, #tpu.memory_space<vmem>>, vector<2x32x256xf32>
    %cst = arith.constant dense<0.000000e+00> : vector<2x32xf32>
    %1 = vector.multi_reduction <add>, %0, %cst [2] : vector<2x32x256xf32> to vector<2x32xf32>
    %cst_2 = arith.constant 3.906250e-03 : f32
    %2 = vector.broadcast %cst_2 : f32 to vector<2x32xf32>
    %3 = arith.mulf %1, %2 : vector<2x32xf32>
    %4 = vector.shape_cast %3 : vector<2x32xf32> to vector<2x32x1xf32>
    %c0_3 = arith.constant 0 : index
    %c0_4 = arith.constant 0 : index
    %5 = vector.load %arg2[%c0_3, %c0_4] : memref<32x2xf32, #tpu.memory_space<vmem>>, vector<32x2xf32>
    %6 = vector.shape_cast %5 : vector<32x2xf32> to vector<1x32x2xf32>
    %7 = vector.broadcast %4 : vector<2x32x1xf32> to vector<2x32x2xf32>
    %8 = vector.broadcast %6 : vector<1x32x2xf32> to vector<2x32x2xf32>
    %9 = arith.mulf %7, %8 : vector<2x32x2xf32>
    %cst_5 = arith.constant dense<0.000000e+00> : vector<2x2xf32>
    %10 = vector.multi_reduction <add>, %9, %cst_5 [1] : vector<2x32x2xf32> to vector<2x2xf32>
    %cst_6 = arith.constant 0.000000e+00 : f32
    %11 = vector.broadcast %cst_6 : f32 to vector<2x2xf32>
    %12 = arith.maximumf %10, %11 : vector<2x2xf32>
    %13 = vector.shape_cast %12 : vector<2x2xf32> to vector<2x2x1xf32>
    %c0_7 = arith.constant 0 : index
    %c0_8 = arith.constant 0 : index
    %14 = vector.load %arg3[%c0_7, %c0_8] : memref<2x32xf32, #tpu.memory_space<vmem>>, vector<2x32xf32>
    %15 = vector.shape_cast %14 : vector<2x32xf32> to vector<1x2x32xf32>
    %16 = vector.broadcast %13 : vector<2x2x1xf32> to vector<2x2x32xf32>
    %17 = vector.broadcast %15 : vector<1x2x32xf32> to vector<2x2x32xf32>
    %18 = arith.mulf %16, %17 : vector<2x2x32xf32>
    %cst_9 = arith.constant dense<0.000000e+00> : vector<2x32xf32>
    %19 = vector.multi_reduction <add>, %18, %cst_9 [1] : vector<2x2x32xf32> to vector<2x32xf32>
    %c0_10 = arith.constant 0 : index
    %c0_11 = arith.constant 0 : index
    %20 = vector.load %arg4[%c0_10, %c0_11] : memref<1x32xf32, #tpu.memory_space<vmem>>, vector<1x32xf32>
    %21 = vector.broadcast %20 : vector<1x32xf32> to vector<2x32xf32>
    %22 = arith.addf %19, %21 : vector<2x32xf32>
    %23 = arith.negf %22 : vector<2x32xf32>
    %24 = math.exp %23 : vector<2x32xf32>
    %cst_12 = arith.constant 1.000000e+00 : f32
    %25 = vector.broadcast %cst_12 : f32 to vector<2x32xf32>
    %26 = arith.addf %25, %24 : vector<2x32xf32>
    %27 = arith.divf %25, %26 : vector<2x32xf32>
    %28 = vector.shape_cast %27 : vector<2x32xf32> to vector<2x32x1xf32>
    %29 = vector.broadcast %28 : vector<2x32x1xf32> to vector<2x32x256xf32>
    %30 = arith.mulf %0, %29 : vector<2x32x256xf32>
    %cst_13 = arith.constant dense<0.000000e+00> : vector<2x256xf32>
    %31 = vector.multi_reduction <add>, %30, %cst_13 [1] : vector<2x32x256xf32> to vector<2x256xf32>
    %cst_14 = arith.constant 3.125000e-02 : f32
    %32 = vector.broadcast %cst_14 : f32 to vector<2x256xf32>
    %33 = arith.mulf %31, %32 : vector<2x256xf32>
    %cst_15 = arith.constant dense<0xFF800000> : vector<2x256xf32>
    %34 = vector.multi_reduction <maximumf>, %30, %cst_15 [1] : vector<2x32x256xf32> to vector<2x256xf32>
    %c0_16 = arith.constant 0 : index
    %c0_17 = arith.constant 0 : index
    %35 = vector.load %arg5[%c0_16, %c0_17] : memref<256x256xf32, #tpu.memory_space<vmem>>, vector<256x256xf32>
    %cst_18 = arith.constant dense<0.000000e+00> : vector<2x256xf32>
    %36 = tpu.matmul %33, %35, %cst_18 {dimension_numbers = #tpu.dot_dimension_numbers<[1], [0], [0], [1], [0, 0, 1, 1], [], []>} : vector<2x256xf32>, vector<256x256xf32>, vector<2x256xf32> -> vector<2x256xf32>
    %c0_19 = arith.constant 0 : index
    %c0_20 = arith.constant 0 : index
    %37 = vector.load %arg6[%c0_19, %c0_20] : memref<256x256xf32, #tpu.memory_space<vmem>>, vector<256x256xf32>
    %cst_21 = arith.constant dense<0.000000e+00> : vector<2x256xf32>
    %38 = tpu.matmul %34, %37, %cst_21 {dimension_numbers = #tpu.dot_dimension_numbers<[1], [0], [0], [1], [0, 0, 1, 1], [], []>} : vector<2x256xf32>, vector<256x256xf32>, vector<2x256xf32> -> vector<2x256xf32>
    %39 = arith.addf %36, %38 : vector<2x256xf32>
    %40 = arith.negf %39 : vector<2x256xf32>
    %41 = math.exp %40 : vector<2x256xf32>
    %cst_22 = arith.constant 1.000000e+00 : f32
    %42 = vector.broadcast %cst_22 : f32 to vector<2x256xf32>
    %43 = arith.addf %42, %41 : vector<2x256xf32>
    %44 = arith.divf %42, %43 : vector<2x256xf32>
    %45 = arith.mulf %39, %44 : vector<2x256xf32>
    %c0_23 = arith.constant 0 : index
    %c0_24 = arith.constant 0 : index
    %46 = vector.load %arg7[%c0_23, %c0_24] : memref<2x256xf32, #tpu.memory_space<vmem>>, vector<2x256xf32>
    tpu.vector_store %arg7[%c0_23, %c0_24], %45 {strides = array<i32>} : memref<2x256xf32, #tpu.memory_space<vmem>>, vector<2x256xf32>,
    return
  }
  func.func @transform_0(%arg0: i32) -> (i32, i32, i32) {
    %c0_i32 = arith.constant 0 : i32
    %c0_i32_0 = arith.constant 0 : i32
    %c0_i32_1 = arith.constant 0 : i32
    return %arg0, %c0_i32, %c0_i32_0 : i32, i32, i32
  }
  func.func @transform_1(%arg0: i32) -> (i32, i32) {
    %c0_i32 = arith.constant 0 : i32
    %c0_i32_0 = arith.constant 0 : i32
    %c0_i32_1 = arith.constant 0 : i32
    return %c0_i32, %c0_i32_0 : i32, i32
  }
  func.func @transform_2(%arg0: i32) -> (i32, i32) {
    %c0_i32 = arith.constant 0 : i32
    %c0_i32_0 = arith.constant 0 : i32
    %c0_i32_1 = arith.constant 0 : i32
    return %c0_i32, %c0_i32_0 : i32, i32
  }
  func.func @transform_3(%arg0: i32) -> (i32, i32) {
    %c0_i32 = arith.constant 0 : i32
    %c0_i32_0 = arith.constant 0 : i32
    %c0_i32_1 = arith.constant 0 : i32
    return %c0_i32, %c0_i32_0 : i32, i32
  }
  func.func @transform_4(%arg0: i32) -> (i32, i32) {
    %c0_i32 = arith.constant 0 : i32
    %c0_i32_0 = arith.constant 0 : i32
    %c0_i32_1 = arith.constant 0 : i32
    return %c0_i32, %c0_i32_0 : i32, i32
  }
  func.func @transform_5(%arg0: i32) -> (i32, i32) {
    %c0_i32 = arith.constant 0 : i32
    %c0_i32_0 = arith.constant 0 : i32
    %c0_i32_1 = arith.constant 0 : i32
    return %c0_i32, %c0_i32_0 : i32, i32
  }
  func.func @transform_6(%arg0: i32) -> (i32, i32) {
    %c0_i32 = arith.constant 0 : i32
    %c0_i32_0 = arith.constant 0 : i32
    return %arg0, %c0_i32 : i32, i32
  }
}

</mosaic_0001>

<bundles_post_ra>
// kernel: cbam_forward.1
= control target key start
LH: loop header
LB: loop body
LE: loop exit
PB: predicated region body
PF: predicated region fallthrough
CT: control target
= control target key end

     0   :  { %vm83_vm0 = vcmask 15360   ;;  %vm121_vm1 = vcmask 254976   ;;  %vm419_vm2 = vcmask 1041409   ;;  %s1322_s0 = inlined_call_operand.vmem [shape: f32[2,32,256], index: 0, kind: input, shape index: {}]   ;;  %s1323_s1 = inlined_call_operand.vmem [shape: f32[32,2], index: 1, kind: input, shape index: {}]   ;;  %s1324_s5 = inlined_call_operand.vmem [shape: f32[256,256], index: 5, kind: input, shape index: {}]   ;;  %s1325_s4 = inlined_call_operand.vmem [shape: f32[256,256], index: 4, kind: input, shape index: {}]   ;;  %s1326_s2 = inlined_call_operand.vmem [shape: f32[2,32], index: 2, kind: input, shape index: {}]   ;;  %s1327_s3 = inlined_call_operand.vmem [shape: f32[1,32], index: 3, kind: input, shape index: {}]   ;;  %s1328_s6 = inlined_call_operand.vmem [shape: f32[2,256], index: 6, kind: output, shape index: {}]  }
   0x1   :  { %v794_v0 = vld [vmem:[%s1322_s0 + $0x40] sm:$0xff]  ;;  %v799_v1 = vld [vmem:[%s1322_s0 + $0x48] sm:$0xff]  ;;  %v816_v5 = vld [vmem:[%s1322_s0 + $0x50] sm:$0xff] }
   0x2   :  { %v804_v2 = vld [vmem:[%s1322_s0] sm:$0xff]  ;;  %v51_v3 = vadd.f32 %v799_v1, %v794_v0  ;;  %v811_v4 = vld [vmem:[%s1322_s0 + $0x8] sm:$0xff]  ;;  %v821_v6 = vld [vmem:[%s1322_s0 + $0x58] sm:$0xff] }
   0x3   :  { %v39_v7 = vadd.f32 %v811_v4, %v804_v2  ;;  %v828_v8 = vld [vmem:[%s1322_s0 + $0x10] sm:$0xff]  ;;  %v833_v9 = vld [vmem:[%s1322_s0 + $0x18] sm:$0xff]  ;;  %v54_v10 = vadd.f32 %v821_v6, %v816_v5  ;;  %v842_v12 = vld [vmem:[%s1322_s0 + $0x60] sm:$0xff] }
   0x4   :  { %52 = vadd.xlane.f32.xlu1 %v51_v3  ;;  %v42_v11 = vadd.f32 %v833_v9, %v828_v8  ;;  %v847_v13 = vld [vmem:[%s1322_s0 + $0x68] sm:$0xff]  ;;  %v852_v14 = vld [vmem:[%s1322_s0 + $0x20] sm:$0xff]  ;;  %v866_v18 = vld [vmem:[%s1322_s0 + $0x70] sm:$0xff] }
   0x5   :  { %40 = vadd.xlane.f32.xlu0 %v39_v7  ;;  %v857_v15 = vld [vmem:[%s1322_s0 + $0x28] sm:$0xff]  ;;  %v57_v16 = vadd.f32 %v847_v13, %v842_v12  ;;  %v871_v19 = vld [vmem:[%s1322_s0 + $0x78] sm:$0xff]  ;;  %v876_v20 = vld [vmem:[%s1322_s0 + $0x30] sm:$0xff] }
   0x6   :  { %v45_v17 = vadd.f32 %v857_v15, %v852_v14  ;;  %v881_v21 = vld [vmem:[%s1322_s0 + $0x38] sm:$0xff]  ;;  %v60_v22 = vadd.f32 %v871_v19, %v866_v18  ;;  %v71_v27 = vld [vmem:[%s1323_s1] sm:$0xff]  ;;  %v72_v30 = vld [vmem:[%s1323_s1 + $0x8] sm:$0xff] }
   0x7   :  { %v48_v23 = vadd.f32 %v881_v21, %v876_v20  ;;  %v73_v40 = vld [vmem:[%s1323_s1 + $0x10] sm:$0xff]  ;;  %v74_v49 = vld [vmem:[%s1323_s1 + $0x18] sm:$0xff] }
   0x8   :  { %55 = vadd.xlane.f32.xlu1 %v54_v10 }
   0x9   :  { %43 = vadd.xlane.f32.xlu0 %v42_v11 }
   0xc   :  { %58 = vadd.xlane.f32.xlu1 %v57_v16 }
   0xd   :  { %46 = vadd.xlane.f32.xlu0 %v45_v17 }
  0x10   :  { %61 = vadd.xlane.f32.xlu1 %v60_v22 }
  0x11   :  { %49 = vadd.xlane.f32.xlu0 %v48_v23 }
  0x91   :  { %v53_v24 = vpop.xlane.xlu1 %52 }
  0x92   :  { %v67_v25 = vmul.f32 0.00390625, %v53_v24  ;;  %v41_v26 = vpop.xlane.xlu0 %40 }
  0x93   :  { %v63_v33 = vmul.f32 0.00390625, %v41_v26 }
  0x94   :  { %v79_v28 = vmul.f32 %v71_v27, %v67_v25 }
  0x95   :  { %v56_v29 = vpop.xlane.xlu1 %55  ;;  %v75_v43 = vmul.f32 %v71_v27, %v63_v33  ;;  %v354_v33 = vld [vmem:[%s1324_s5 + $0x18] sm:$0xff] }
  0x96   :  { %v68_v31 = vmul.f32 0.00390625, %v56_v29  ;;  %v44_v32 = vpop.xlane.xlu0 %43  ;;  %v97_v35 = vsel %vm83_vm0, %v79_v28, 0.0 }
  0x97   :  { %v64_v34 = vmul.f32 0.00390625, %v44_v32  ;;  %v84_v54 = vsel %vm83_vm0, %v75_v43, 0.0  ;;  %v352_v32 = vld [vmem:[%s1324_s5 + $0x8] sm:$0xff] }
  0x98   :  { %v80_v36 = vmul.f32 %v72_v30, %v68_v31  ;;  %v356_v43 = vld [vmem:[%s1324_s5 + $0x28] sm:$0xff] }
  0x99   :  { %v76_v37 = vmul.f32 %v72_v30, %v64_v34  ;;  %v59_v38 = vpop.xlane.xlu1 %58  ;;  %v351_v34 = vld [vmem:[%s1324_s5] sm:$0xff] }
  0x9a   :  { %v98_v39 = vsel %vm83_vm0, %v80_v36, 0.0  ;;  %v69_v41 = vmul.f32 0.00390625, %v59_v38  ;;  %v47_v42 = vpop.xlane.xlu0 %46  ;;  %v353_v36 = vld [vmem:[%s1324_s5 + $0x10] sm:$0xff]  ;;  %v290_v38 = vld [vmem:[%s1325_s4 + $0x18] sm:$0xff] }
  0x9b   :  { %v99_v44 = vadd.f32 %v98_v39, %v97_v35  ;;  %v65_v45 = vmul.f32 0.00390625, %v47_v42  ;;  %v85_v47 = vsel %vm83_vm0, %v76_v37, 0.0  ;;  %v610_v35 = vpack.c.bf16 %v354_v33, %v352_v32  ;;  %v288_v37 = vld [vmem:[%s1325_s4 + $0x8] sm:$0xff]  ;;  %v289_v42 = vld [vmem:[%s1325_s4 + $0x10] sm:$0xff] }
  0x9c   :  { %v81_v46 = vmul.f32 %v73_v40, %v69_v41  ;;  %v86_v58 = vadd.f32 %v85_v47, %v84_v54  ;;  %v612_v39 = vpack.c.bf16 %v353_v36, %v351_v34  ;;  %v287_v41 = vld [vmem:[%s1325_s4] sm:$0xff]  ;;  %v357_v47 = vld [vmem:[%s1324_s5 + $0x30] sm:$0xff]  ;;  %v304_v33 = vld [vmem:[%s1325_s4 + $0x88] sm:$0xff] }
  0x9d   :  { %v77_v48 = vmul.f32 %v73_v40, %v65_v45  ;;  %v62_v50 = vpop.xlane.xlu1 %61  ;;  %v674_v40 = vpack.c.bf16 %v290_v38, %v288_v37  ;;  %611 = vmatprep.subr.bf16.mxu1 %v610_v35  ;;  %v358_v45 = vld [vmem:[%s1324_s5 + $0x38] sm:$0xff]  ;;  %v293_v54 = vld [vmem:[%s1325_s4 + $0x30] sm:$0xff]  ;;  %v367_v37 = vld [vmem:[%s1324_s5 + $0x80] sm:$0xff] }
  0x9e   :  { %v100_v51 = vsel %vm83_vm0, %v81_v46, 0.0  ;;  %v70_v52 = vmul.f32 0.00390625, %v62_v50  ;;  %v50_v53 = vpop.xlane.xlu0 %49  ;;  %v355_v46 = vld [vmem:[%s1324_s5 + $0x20] sm:$0xff]  ;;  %613 = vmatpush1.bf16.msra.mxu1 %v612_v39  ;;  %v292_v50 = vld [vmem:[%s1325_s4 + $0x28] sm:$0xff]  ;;  %v306_v34 = vld [vmem:[%s1325_s4 + $0x98] sm:$0xff] }
  0x9f   :  { %v101_v55 = vadd.f32 %v100_v51, %v99_v44  ;;  %v87_v56 = vsel %vm83_vm0, %v77_v48, 0.0  ;;  %v66_v57 = vmul.f32 0.00390625, %v50_v53  ;;  %v676_v44 = vpack.c.bf16 %v289_v42, %v287_v41  ;;  %675 = vmatprep.subr.bf16.mxu0 %v674_v40  ;;  %v294_v51 = vld [vmem:[%s1325_s4 + $0x38] sm:$0xff]  ;;  %v369_v38 = vld [vmem:[%s1324_s5 + $0x90] sm:$0xff]  ;;  %v303_v39 = vld [vmem:[%s1325_s4 + $0x80] sm:$0xff] }
  0xa0   :  { %v82_v59 = vmul.f32 %v74_v49, %v70_v52  ;;  %v88_v61 = vadd.f32 %v87_v56, %v86_v58  ;;  %v614_v48 = vpack.c.bf16 %v358_v45, %v356_v43  ;;  %v291_v52 = vld [vmem:[%s1325_s4 + $0x20] sm:$0xff]  ;;  %v678_v53 = vpack.c.bf16 %v294_v51, %v292_v50  ;;  %v362_v56 = vld [vmem:[%s1324_s5 + $0x58] sm:$0xff]  ;;  %v305_v41 = vld [vmem:[%s1325_s4 + $0x90] sm:$0xff] }
  0xa1   :  { %v78_v60 = vmul.f32 %v74_v49, %v66_v57  ;;  %v616_v49 = vpack.c.bf16 %v357_v47, %v355_v46  ;;  %677 = vmatpush1.bf16.msra.mxu0 %v676_v44  ;;  %v680_v57 = vpack.c.bf16 %v293_v54, %v291_v52  ;;  %v690_v40 = vpack.c.bf16 %v306_v34, %v304_v33  ;;  %v372_v42 = vld [vmem:[%s1324_s5 + $0xa8] sm:$0xff]  ;;  %v374_v43 = vld [vmem:[%s1324_s5 + $0xb8] sm:$0xff]  ;;  %v373_v50 = vld [vmem:[%s1324_s5 + $0xb0] sm:$0xff] }
  0xa2   :  { %v102_v62 = vsel %vm83_vm0, %v82_v59, 0.0  ;;  %615 = vmatprep.subr.bf16.mxu1 %v614_v48  ;;  %v359_v59 = vld [vmem:[%s1324_s5 + $0x40] sm:$0xff]  ;;  %679 = vmatprep.subr.bf16.mxu0 %v678_v53  ;;  %v308_v44 = vld [vmem:[%s1325_s4 + $0xa8] sm:$0xff]  ;;  %v310_v45 = vld [vmem:[%s1325_s4 + $0xb8] sm:$0xff]  ;;  %v628_v46 = vpack.c.bf16 %v369_v38, %v367_v37  ;;  %v692_v47 = vpack.c.bf16 %v305_v41, %v303_v39  ;;  %v630_v48 = vpack.c.bf16 %v374_v43, %v372_v42 }
  0xa3   :  { %v103_v63 = vadd.f32 %v102_v62, %v101_v55  ;;  %v89_v3 = vsel %vm83_vm0, %v78_v60, 0.0  ;;  %v360_v55 = vld [vmem:[%s1324_s5 + $0x48] sm:$0xff]  ;;  %v361_v60 = vld [vmem:[%s1324_s5 + $0x50] sm:$0xff]  ;;  %v298_v62 = vld [vmem:[%s1325_s4 + $0x58] sm:$0xff]  ;;  %617 = vmatpush1.bf16.msra.mxu1 %v616_v49  ;;  %v694_v52 = vpack.c.bf16 %v310_v45, %v308_v44 }
  0xa4   :  { %v90_v7 = vadd.f32 %v89_v3, %v88_v61  ;;  %v618_v58 = vpack.c.bf16 %v362_v56, %v360_v55  ;;  %v296_v61 = vld [vmem:[%s1325_s4 + $0x48] sm:$0xff]  ;;  %v297_v3 = vld [vmem:[%s1325_s4 + $0x50] sm:$0xff]  ;;  %v371_v49 = vld [vmem:[%s1324_s5 + $0xa0] sm:$0xff] }
  0xa5   :  { %v104_v10 = vrot.slane %v103_v63, 4  ;;  %681 = vmatpush1.bf16.msra.mxu0 %v680_v57  ;;  %v307_v51 = vld [vmem:[%s1325_s4 + $0xa0] sm:$0xff]  ;;  %v309_v53 = vld [vmem:[%s1325_s4 + $0xb0] sm:$0xff]  ;;  %v376_v54 = vld [vmem:[%s1324_s5 + $0xc8] sm:$0xff] }
  0xa6   :  { %v91_v11 = vrot.slane %v90_v7, 4  ;;  %619 = vmatprep.subr.bf16.mxu1 %v618_v58  ;;  %v378_v55 = vld [vmem:[%s1324_s5 + $0xd8] sm:$0xff]  ;;  %v312_v56 = vld [vmem:[%s1325_s4 + $0xc8] sm:$0xff]  ;;  %v632_v58 = vpack.c.bf16 %v373_v50, %v371_v49  ;;  %v604_v42 = vld [vmem:[%s1327_s3] ss:$0 sm:$0xff] }
  0xa7   :  { %v105_v16 = vadd.f32 %v104_v10, %v103_v63  ;;  %v295_v63 = vld [vmem:[%s1325_s4 + $0x40] sm:$0xff]  ;;  %v682_v10 = vpack.c.bf16 %v298_v62, %v296_v61  ;;  %v314_v57 = vld [vmem:[%s1325_s4 + $0xd8] sm:$0xff]  ;;  %v377_v62 = vld [vmem:[%s1324_s5 + $0xd0] sm:$0xff] }
  0xa8   :  { %v92_v17 = vadd.f32 %v91_v11, %v90_v7  ;;  %v620_v7 = vpack.c.bf16 %v361_v60, %v359_v59  ;;  %v364_v11 = vld [vmem:[%s1324_s5 + $0x68] sm:$0xff]  ;;  %v696_v59 = vpack.c.bf16 %v309_v53, %v307_v51  ;;  %v634_v60 = vpack.c.bf16 %v378_v55, %v376_v54  ;;  %v375_v61 = vld [vmem:[%s1324_s5 + $0xc0] sm:$0xff]  ;;  %v318_v54 = vld [vmem:[%s1325_s4 + $0xf8] sm:$0xff] }
  0xa9   :  { %v106_v22 = vrot.slane %v105_v16, 2  ;;  %683 = vmatprep.subr.bf16.mxu0 %v682_v10  ;;  %v380_v10 = vld [vmem:[%s1324_s5 + $0xe8] sm:$0xff] }
  0xaa   :  { %v93_v23 = vrot.slane %v92_v17, 2  ;;  %621 = vmatpush1.bf16.msra.mxu1 %v620_v7  ;;  %v313_v7 = vld [vmem:[%s1325_s4 + $0xd0] sm:$0xff]  ;;  %v316_v53 = vld [vmem:[%s1325_s4 + $0xe8] sm:$0xff] }
  0xab   :  { %v107_v24 = vadd.f32 %v106_v22, %v105_v16  ;;  %v366_v16 = vld [vmem:[%s1324_s5 + $0x78] sm:$0xff]  ;;  %v684_v22 = vpack.c.bf16 %v297_v3, %v295_v63  ;;  %v311_v63 = vld [vmem:[%s1325_s4 + $0xc0] sm:$0xff]  ;;  %v698_v3 = vpack.c.bf16 %v314_v57, %v312_v56  ;;  %v157_v56 = vlaneseq }
  0xac   :  { %v94_v25 = vadd.f32 %v93_v23, %v92_v17  ;;  %v363_v17 = vld [vmem:[%s1324_s5 + $0x60] sm:$0xff]  ;;  %v622_v23 = vpack.c.bf16 %v366_v16, %v364_v11  ;;  %v382_v11 = vld [vmem:[%s1324_s5 + $0xf8] sm:$0xff]  ;;  %v636_v16 = vpack.c.bf16 %v377_v62, %v375_v61  ;;  %v702_v57 = vpack.c.bf16 %v318_v54, %v316_v53  ;;  %v384_v61 = vld [vmem:[%s1324_s5 + $0x108] sm:$0xff] }
  0xad   :  { %v108_v26 = vrot.slane %v107_v24, 1  ;;  %685 = vmatpush1.bf16.msra.mxu0 %v684_v22  ;;  %v638_v22 = vpack.c.bf16 %v382_v11, %v380_v10  ;;  %v386_v62 = vld [vmem:[%s1324_s5 + $0x118] sm:$0xff]  ;;  %v320_v11 = vld [vmem:[%s1325_s4 + $0x108] sm:$0xff]  ;;  %v329_v53 = vld [vmem:[%s1325_s4 + $0x150] sm:$0xff] }
  0xae   :  { %v95_v27 = vrot.slane %v94_v25, 1  ;;  %623 = vmatprep.subr.bf16.mxu1 %v622_v23  ;;  %v379_v23 = vld [vmem:[%s1324_s5 + $0xe0] sm:$0xff] }
  0xaf   :  { %v109_v28 = vadd.f32 %v108_v26, %v107_v24  ;;  %v365_v24 = vld [vmem:[%s1324_s5 + $0x70] sm:$0xff]  ;;  %v302_v26 = vld [vmem:[%s1325_s4 + $0x78] sm:$0xff] }
  0xb0   :  { %v96_v29 = vadd.f32 %v95_v27, %v94_v25  ;;  %v300_v25 = vld [vmem:[%s1325_s4 + $0x68] sm:$0xff]  ;;  %v624_v32 = vpack.c.bf16 %v365_v24, %v363_v17  ;;  %v700_v17 = vpack.c.bf16 %v313_v7, %v311_v63  ;;  %v381_v24 = vld [vmem:[%s1324_s5 + $0xf0] sm:$0xff]  ;;  %v642_v63 = vpack.c.bf16 %v386_v62, %v384_v61  ;;  %v334_v62 = vld [vmem:[%s1325_s4 + $0x178] sm:$0xff] }
  0xb1   :  { %v111_v30 = vmax.f32 %v109_v28, 0.0  ;;  %v686_v27 = vpack.c.bf16 %v302_v26, %v300_v25  ;;  %v299_v28 = vld [vmem:[%s1325_s4 + $0x60] sm:$0xff]  ;;  %v640_v25 = vpack.c.bf16 %v381_v24, %v379_v23  ;;  %v385_v7 = vld [vmem:[%s1324_s5 + $0x110] sm:$0xff]  ;;  %v332_v61 = vld [vmem:[%s1325_s4 + $0x168] sm:$0xff] }
  0xb2   :  { %v110_v31 = vmax.f32 %v96_v29, 0.0  ;;  %v301_v29 = vld [vmem:[%s1325_s4 + $0x70] sm:$0xff]  ;;  %625 = vmatpush1.bf16.msra.mxu1 %v624_v32  ;;  %v118_v26 = vld [vmem:[%s1326_s2] sm:$0x3] }
  0xb3   :  { %116 = vbcast.lane.b32.xlu1 %v111_v30, 256  ;;  %v368_v30 = vld [vmem:[%s1324_s5 + $0x88] sm:$0xff]  ;;  %v688_v35 = vpack.c.bf16 %v301_v29, %v299_v28  ;;  %687 = vmatprep.subr.bf16.mxu0 %v686_v27  ;;  %v319_v23 = vld [vmem:[%s1325_s4 + $0x100] sm:$0xff]  ;;  %v321_v24 = vld [vmem:[%s1325_s4 + $0x110] sm:$0xff] }
  0xb4   :  { %113 = vbcast.lane.b32.xlu0 %v110_v31, 256  ;;  %v370_v31 = vld [vmem:[%s1324_s5 + $0x98] sm:$0xff] }
  0xb5   :  { %v626_v36 = vpack.c.bf16 %v370_v31, %v368_v30  ;;  %689 = vmatpush1.bf16.msra.mxu0 %v688_v35 }
  0xb6   :  { %691 = vmatprep.subr.bf16.mxu0 %v690_v40 }
  0xb7   :  { %627 = vmatprep.subr.bf16.mxu1 %v626_v36 }
  0xb8   :  { %629 = vmatpush1.bf16.msra.mxu1 %v628_v46 }
  0xb9   :  { %693 = vmatpush1.bf16.msra.mxu0 %v692_v47  ;;  %631 = vmatprep.subr.bf16.mxu1 %v630_v48 }
  0xba   :  { %695 = vmatprep.subr.bf16.mxu0 %v694_v52 }
  0xbc   :  { %633 = vmatpush1.bf16.msra.mxu1 %v632_v58  ;;  %v315_v58 = vld [vmem:[%s1325_s4 + $0xe0] sm:$0xff] }
  0xbd   :  { %697 = vmatpush1.bf16.msra.mxu0 %v696_v59  ;;  %635 = vmatprep.subr.bf16.mxu1 %v634_v60  ;;  %v317_v59 = vld [vmem:[%s1325_s4 + $0xf0] sm:$0xff] }
  0xbe   :  { %699 = vmatprep.subr.bf16.mxu0 %v698_v3  ;;  %v704_v60 = vpack.c.bf16 %v317_v59, %v315_v58  ;;  %v383_v3 = vld [vmem:[%s1324_s5 + $0x100] sm:$0xff]  ;;  %v397_v59 = vld [vmem:[%s1324_s5 + $0x170] sm:$0xff] }
  0xbf   :  { %v644_v10 = vpack.c.bf16 %v385_v7, %v383_v3  ;;  %v395_v58 = vld [vmem:[%s1324_s5 + $0x160] sm:$0xff]  ;;  %v333_v7 = vld [vmem:[%s1325_s4 + $0x170] sm:$0xff] }
  0xc0   :  { %637 = vmatpush1.bf16.msra.mxu1 %v636_v16  ;;  %v322_v16 = vld [vmem:[%s1325_s4 + $0x118] sm:$0xff]  ;;  %v331_v3 = vld [vmem:[%s1325_s4 + $0x160] sm:$0xff] }
  0xc1   :  { %701 = vmatpush1.bf16.msra.mxu0 %v700_v17  ;;  %639 = vmatprep.subr.bf16.mxu1 %v638_v22  ;;  %v158_v17 = vshrl.u32 %v157_v56, 7  ;;  %v706_v22 = vpack.c.bf16 %v322_v16, %v320_v11  ;;  %v398_v56 = vld [vmem:[%s1324_s5 + $0x178] sm:$0xff]  ;;  %v400_v11 = vld [vmem:[%s1324_s5 + $0x188] sm:$0xff] }
  0xc2   :  { %703 = vmatprep.subr.bf16.mxu0 %v702_v57  ;;  %v402_v16 = vld [vmem:[%s1324_s5 + $0x198] sm:$0xff] }
  0xc4   :  { %641 = vmatpush1.bf16.msra.mxu1 %v640_v25  ;;  %v708_v25 = vpack.c.bf16 %v321_v24, %v319_v23  ;;  %v401_v23 = vld [vmem:[%s1324_s5 + $0x190] sm:$0xff] }
  0xc5   :  { %705 = vmatpush1.bf16.msra.mxu0 %v704_v60  ;;  %643 = vmatprep.subr.bf16.mxu1 %v642_v63  ;;  %v656_v60 = vpack.c.bf16 %v397_v59, %v395_v58  ;;  %v718_v63 = vpack.c.bf16 %v334_v62, %v332_v61  ;;  %v411_v59 = vld [vmem:[%s1324_s5 + $0x1e0] sm:$0xff]  ;;  %v348_v61 = vld [vmem:[%s1325_s4 + $0x1e8] sm:$0xff] }
  0xc6   :  { %707 = vmatprep.subr.bf16.mxu0 %v706_v22  ;;  %v399_v22 = vld [vmem:[%s1324_s5 + $0x180] sm:$0xff] }
  0xc7   :  { %v660_v24 = vpack.c.bf16 %v401_v23, %v399_v22 }
  0xc8   :  { %645 = vmatpush1.bf16.msra.mxu1 %v644_v10  ;;  %v720_v10 = vpack.c.bf16 %v333_v7, %v331_v3  ;;  %v347_v3 = vld [vmem:[%s1325_s4 + $0x1e0] sm:$0xff]  ;;  %v349_v7 = vld [vmem:[%s1325_s4 + $0x1f0] sm:$0xff] }
  0xc9   :  { %709 = vmatpush1.bf16.msra.mxu0 %v708_v25  ;;  %v336_v25 = vld [vmem:[%s1325_s4 + $0x188] sm:$0xff] }
 0x125   :  { %v117_v27 = vpop.permute.xlu1 %116 }
 0x126   :  { %v120_v28 = vmul.f32 %v118_v26, %v117_v27  ;;  %v114_v29 = vpop.permute.xlu0 %113  ;;  %v390_v27 = vld [vmem:[%s1324_s5 + $0x138] sm:$0xff] }
 0x127   :  { %v119_v30 = vmul.f32 %v118_v26, %v114_v29  ;;  %v388_v26 = vld [vmem:[%s1324_s5 + $0x128] sm:$0xff]  ;;  %v387_v29 = vld [vmem:[%s1324_s5 + $0x120] sm:$0xff] }
 0x128   :  { %v129_v31 = vsel %vm121_vm1, %v120_v28, 0.0  ;;  %v646_v28 = vpack.c.bf16 %v390_v27, %v388_v26  ;;  %v338_v26 = vld [vmem:[%s1325_s4 + $0x198] sm:$0xff] }
 0x129   :  { %v130_v32 = vrot.slane %v129_v31, 4  ;;  %v122_v33 = vsel %vm121_vm1, %v119_v30, 0.0  ;;  %v389_v30 = vld [vmem:[%s1324_s5 + $0x130] sm:$0xff]  ;;  %v722_v27 = vpack.c.bf16 %v338_v26, %v336_v25 }
 0x12a   :  { %v123_v34 = vrot.slane %v122_v33, 4  ;;  %647 = vmatprep.subr.bf16.mxu1 %v646_v28  ;;  %v335_v28 = vld [vmem:[%s1325_s4 + $0x180] sm:$0xff] }
 0x12b   :  { %v131_v35 = vadd.f32 %v130_v32, %v129_v31  ;;  %v648_v31 = vpack.c.bf16 %v389_v30, %v387_v29  ;;  %v159_v32 = vsub.s32 0, %v158_v17  ;;  %v658_v17 = vpack.c.bf16 %v402_v16, %v400_v11  ;;  %v337_v29 = vld [vmem:[%s1325_s4 + $0x190] sm:$0xff] }
 0x12c   :  { %v124_v36 = vadd.f32 %v123_v34, %v122_v33  ;;  %v324_v33 = vld [vmem:[%s1325_s4 + $0x128] sm:$0xff]  ;;  %v326_v34 = vld [vmem:[%s1325_s4 + $0x138] sm:$0xff]  ;;  %v724_v30 = vpack.c.bf16 %v337_v29, %v335_v28 }
 0x12d   :  { %v132_v37 = vrot.slane %v131_v35, 2  ;;  %649 = vmatpush1.bf16.msra.mxu1 %v648_v31  ;;  %v404_v31 = vld [vmem:[%s1324_s5 + $0x1a8] sm:$0xff] }
 0x12e   :  { %v125_v38 = vrot.slane %v124_v36, 2 }
 0x12f   :  { %v133_v39 = vadd.f32 %v132_v37, %v131_v35  ;;  %v710_v35 = vpack.c.bf16 %v326_v34, %v324_v33  ;;  %v325_v37 = vld [vmem:[%s1325_s4 + $0x130] sm:$0xff]  ;;  %v403_v34 = vld [vmem:[%s1324_s5 + $0x1a0] sm:$0xff] }
 0x130   :  { %v126_v40 = vadd.f32 %v125_v38, %v124_v36  ;;  %v323_v36 = vld [vmem:[%s1325_s4 + $0x120] sm:$0xff] }
 0x131   :  { %v134_v41 = vrot.slane %v133_v39, 1  ;;  %v712_v38 = vpack.c.bf16 %v325_v37, %v323_v36  ;;  %711 = vmatprep.subr.bf16.mxu0 %v710_v35  ;;  %v405_v35 = vld [vmem:[%s1324_s5 + $0x1b0] sm:$0xff]  ;;  %v340_v37 = vld [vmem:[%s1325_s4 + $0x1a8] sm:$0xff] }
 0x132   :  { %v127_v43 = vrot.slane %v126_v40, 1  ;;  %v664_v36 = vpack.c.bf16 %v405_v35, %v403_v34 }
 0x133   :  { %v135_v44 = vadd.f32 %v134_v41, %v133_v39  ;;  %v392_v39 = vld [vmem:[%s1324_s5 + $0x148] sm:$0xff]  ;;  %713 = vmatpush1.bf16.msra.mxu0 %v712_v38  ;;  %v342_v38 = vld [vmem:[%s1325_s4 + $0x1b8] sm:$0xff] }
 0x134   :  { %v128_v45 = vadd.f32 %v127_v43, %v126_v40  ;;  %v394_v40 = vld [vmem:[%s1324_s5 + $0x158] sm:$0xff]  ;;  %v391_v43 = vld [vmem:[%s1324_s5 + $0x140] sm:$0xff] }
 0x135   :  { %v144_v46 = vadd.f32 %v604_v42, %v135_v44  ;;  %v393_v44 = vld [vmem:[%s1324_s5 + $0x150] sm:$0xff] }
 0x136   :  { %v143_v47 = vadd.f32 %v604_v42, %v128_v45  ;;  %v650_v42 = vpack.c.bf16 %v394_v40, %v392_v39  ;;  %v726_v39 = vpack.c.bf16 %v342_v38, %v340_v37  ;;  %v339_v40 = vld [vmem:[%s1325_s4 + $0x1a0] sm:$0xff] }
 0x137   :  { %v606_v48 = vmul.f32 -1.442695, %v144_v46 }
 0x138   :  { %v605_v49 = vmul.f32 -1.442695, %v143_v47  ;;  %v652_v47 = vpack.c.bf16 %v393_v44, %v391_v43  ;;  %651 = vmatprep.subr.bf16.mxu1 %v650_v42  ;;  %v408_v43 = vld [vmem:[%s1324_s5 + $0x1c8] sm:$0xff]  ;;  %v410_v44 = vld [vmem:[%s1324_s5 + $0x1d8] sm:$0xff] }
 0x139   :  { %740 = vpow2.f32 %v606_v48  ;;  %v328_v48 = vld [vmem:[%s1325_s4 + $0x148] sm:$0xff] }
 0x13a   :  { %742 = vpow2.f32 %v605_v49  ;;  %v330_v49 = vld [vmem:[%s1325_s4 + $0x158] sm:$0xff]  ;;  %653 = vmatpush1.bf16.msra.mxu1 %v652_v47  ;;  %v407_v47 = vld [vmem:[%s1324_s5 + $0x1c0] sm:$0xff] }
 0x143   :  { %v741_v50 = vpop.eup %740 }
 0x144   :  { %v743_v51 = vpop.eup %742  ;;  %v152_v52 = vadd.f32 1.0, %v741_v50 }
 0x145   :  { %v151_v55 = vadd.f32 1.0, %v743_v51  ;;  %v714_v51 = vpack.c.bf16 %v330_v49, %v328_v48  ;;  %v409_v48 = vld [vmem:[%s1324_s5 + $0x1d0] sm:$0xff] }
 0x146   :  { %744 = vrcp.f32 %v152_v52  ;;  %v327_v52 = vld [vmem:[%s1325_s4 + $0x140] sm:$0xff]  ;;  %v668_v49 = vpack.c.bf16 %v409_v48, %v407_v47 }
 0x147   :  { %746 = vrcp.f32 %v151_v55  ;;  %v716_v54 = vpack.c.bf16 %v329_v53, %v327_v52  ;;  %v396_v55 = vld [vmem:[%s1324_s5 + $0x168] sm:$0xff]  ;;  %715 = vmatprep.subr.bf16.mxu0 %v714_v51  ;;  %v346_v51 = vld [vmem:[%s1325_s4 + $0x1d8] sm:$0xff]  ;;  %v343_v53 = vld [vmem:[%s1325_s4 + $0x1c0] sm:$0xff] }
 0x148   :  { %v654_v57 = vpack.c.bf16 %v398_v56, %v396_v55  ;;  %v412_v56 = vld [vmem:[%s1324_s5 + $0x1e8] sm:$0xff] }
 0x149   :  { %717 = vmatpush1.bf16.msra.mxu0 %v716_v54  ;;  %v345_v54 = vld [vmem:[%s1325_s4 + $0x1d0] sm:$0xff] }
 0x14a   :  { %655 = vmatprep.subr.bf16.mxu1 %v654_v57  ;;  %719 = vmatprep.subr.bf16.mxu0 %v718_v63  ;;  %v732_v55 = vpack.c.bf16 %v345_v54, %v343_v53  ;;  %v414_v57 = vld [vmem:[%s1324_s5 + $0x1f8] sm:$0xff] }
 0x14b   :  { %657 = vmatpush1.bf16.msra.mxu1 %v656_v60  ;;  %v670_v58 = vpack.c.bf16 %v414_v57, %v412_v56  ;;  %v413_v60 = vld [vmem:[%s1324_s5 + $0x1f0] sm:$0xff] }
 0x14c   :  { %659 = vmatprep.subr.bf16.mxu1 %v658_v17  ;;  %v672_v62 = vpack.c.bf16 %v413_v60, %v411_v59 }
 0x14d   :  { %721 = vmatpush1.bf16.msra.mxu0 %v720_v10  ;;  %v736_v10 = vpack.c.bf16 %v349_v7, %v347_v3 }
 0x14e   :  { %723 = vmatprep.subr.bf16.mxu0 %v722_v27 }
 0x14f   :  { %661 = vmatpush1.bf16.msra.mxu1 %v660_v24 }
 0x150   :  { %v745_v41 = vpop.eup %744 }
 0x151   :  { %v747_v45 = vpop.eup %746  ;;  %v1165_v46 = vrot.slane %v745_v41, %v159_v32  ;;  %725 = vmatpush1.bf16.msra.mxu0 %v724_v30  ;;  %v341_v41 = vld [vmem:[%s1325_s4 + $0x1b0] sm:$0xff] }
 0x152   :  { %v160_v50 = vrot.slane %v747_v45, %v159_v32  ;;  %v406_v32 = vld [vmem:[%s1324_s5 + $0x1b8] sm:$0xff]  ;;  %v728_v42 = vpack.c.bf16 %v341_v41, %v339_v40  ;;  %727 = vmatprep.subr.bf16.mxu0 %v726_v39  ;;  %v666_v45 = vpack.c.bf16 %v410_v44, %v408_v43 }
 0x153   :  { %181 = vbcast.lane.b32.xlu0 %v1165_v46, 256  ;;  %v662_v33 = vpack.c.bf16 %v406_v32, %v404_v31 }
 0x154   :  { %162 = vbcast.lane.b32.xlu1 %v160_v50, 256 }
 0x155   :  { %663 = vmatprep.subr.bf16.mxu1 %v662_v33  ;;  %729 = vmatpush1.bf16.msra.mxu0 %v728_v42 }
 0x156   :  { %665 = vmatpush1.bf16.msra.mxu1 %v664_v36 }
 0x157   :  { %170 = vbcast.lane.b32.xlu0 %v160_v50, 272  ;;  %667 = vmatprep.subr.bf16.mxu1 %v666_v45 }
 0x158   :  { %166 = vbcast.lane.b32.xlu1 %v160_v50, 264 }
 0x15a   :  { %669 = vmatpush1.bf16.msra.mxu1 %v668_v49 }
 0x15b   :  { %174 = vbcast.lane.b32.xlu0 %v160_v50, 280  ;;  %v344_v50 = vld [vmem:[%s1325_s4 + $0x1c8] sm:$0xff]  ;;  %671 = vmatprep.subr.bf16.mxu1 %v670_v58 }
 0x15c   :  { %185 = vbcast.lane.b32.xlu1 %v1165_v46, 264  ;;  %v730_v52 = vpack.c.bf16 %v346_v51, %v344_v50 }
 0x15e   :  { %731 = vmatprep.subr.bf16.mxu0 %v730_v52  ;;  %673 = vmatpush1.bf16.msra.mxu1 %v672_v62 }
 0x15f   :  { %733 = vmatpush1.bf16.msra.mxu0 %v732_v55 }
 0x160   :  { %189 = vbcast.lane.b32.xlu1 %v1165_v46, 272 }
 0x164   :  { %193 = vbcast.lane.b32.xlu1 %v1165_v46, 280  ;;  %v350_v46 = vld [vmem:[%s1325_s4 + $0x1f8] sm:$0xff] }
 0x165   :  { %v734_v63 = vpack.c.bf16 %v350_v46, %v348_v61 }
 0x167   :  { %735 = vmatprep.subr.bf16.mxu0 %v734_v63 }
 0x168   :  { %737 = vmatpush1.bf16.msra.mxu0 %v736_v10 }
 0x1c5   :  { %v182_v11 = vpop.permute.xlu0 %181 }
 0x1c6   :  { %v163_v16 = vpop.permute.xlu1 %162  ;;  %v203_v41 = vmul.f32 %v182_v11, %v794_v0  ;;  %v204_v42 = vmul.f32 %v182_v11, %v799_v1 }
 0x1c7   :  { %v195_v23 = vmul.f32 %v163_v16, %v804_v2  ;;  %v196_v24 = vmul.f32 %v163_v16, %v811_v4 }
 0x1c9   :  { %v171_v17 = vpop.permute.xlu0 %170 }
 0x1ca   :  { %v167_v22 = vpop.permute.xlu1 %166  ;;  %v199_v27 = vmul.f32 %v171_v17, %v852_v14  ;;  %v200_v28 = vmul.f32 %v171_v17, %v857_v15 }
 0x1cb   :  { %v197_v25 = vmul.f32 %v167_v22, %v828_v8  ;;  %v198_v26 = vmul.f32 %v167_v22, %v833_v9 }
 0x1cd   :  { %v211_v29 = vadd.f32 %v197_v25, %v195_v23  ;;  %v220_v30 = vadd.f32 %v198_v26, %v196_v24  ;;  %v251_v31 = vmax.f32 %v195_v23, %v197_v25  ;;  %v260_v32 = vmax.f32 %v196_v24, %v198_v26  ;;  %v175_v33 = vpop.permute.xlu0 %174 }
 0x1ce   :  { %v186_v34 = vpop.permute.xlu1 %185  ;;  %v201_v35 = vmul.f32 %v175_v33, %v876_v20  ;;  %v202_v2 = vmul.f32 %v175_v33, %v881_v21 }
 0x1cf   :  { %v212_v36 = vadd.f32 %v211_v29, %v199_v27  ;;  %v221_v4 = vadd.f32 %v220_v30, %v200_v28  ;;  %v252_v37 = vmax.f32 %v251_v31, %v199_v27  ;;  %v261_v8 = vmax.f32 %v260_v32, %v200_v28 }
 0x1d0   :  { %v205_v9 = vmul.f32 %v186_v34, %v816_v5  ;;  %v206_v14 = vmul.f32 %v186_v34, %v821_v6 }
 0x1d1   :  { %v213_v38 = vadd.f32 %v212_v36, %v201_v35  ;;  %v222_v15 = vadd.f32 %v221_v4, %v202_v2  ;;  %v253_v39 = vmax.f32 %v252_v37, %v201_v35  ;;  %v262_v40 = vmax.f32 %v261_v8, %v202_v2 }
 0x1d2   :  { %v190_v43 = vpop.permute.xlu1 %189  ;;  %v229_v47 = vadd.f32 %v205_v9, %v203_v41  ;;  %v238_v48 = vadd.f32 %v206_v14, %v204_v42  ;;  %v269_v53 = vmax.f32 %v203_v41, %v205_v9  ;;  %v278_v54 = vmax.f32 %v204_v42, %v206_v14 }
 0x1d3   :  { %v214_v20 = vrot.slane %v213_v38, 4  ;;  %v223_v44 = vrot.slane %v222_v15, 4  ;;  %v254_v21 = vrot.slane %v253_v39, 4  ;;  %v263_v45 = vrot.slane %v262_v40, 4 }
 0x1d4   :  { %v207_v49 = vmul.f32 %v190_v43, %v842_v12  ;;  %v208_v5 = vmul.f32 %v190_v43, %v847_v13 }
 0x1d5   :  { %v215_v6 = vadd.f32 %v214_v20, %v213_v38  ;;  %v224_v50 = vadd.f32 %v223_v44, %v222_v15  ;;  %v255_v51 = vmax.f32 %v253_v39, %v254_v21  ;;  %v264_v52 = vmax.f32 %v262_v40, %v263_v45 }
 0x1d6   :  { %v194_v0 = vpop.permute.xlu1 %193  ;;  %v230_v56 = vadd.f32 %v229_v47, %v207_v49  ;;  %v239_v57 = vadd.f32 %v238_v48, %v208_v5  ;;  %v270_v58 = vmax.f32 %v269_v53, %v207_v49  ;;  %v279_v59 = vmax.f32 %v278_v54, %v208_v5 }
 0x1d7   :  { %v216_v55 = vrot.slane %v215_v6, 2  ;;  %v225_v1 = vrot.slane %v224_v50, 2  ;;  %v209_v60 = vmul.f32 %v194_v0, %v866_v18  ;;  %v210_v61 = vmul.f32 %v194_v0, %v871_v19 }
 0x1d8   :  { %v256_v12 = vrot.slane %v255_v51, 2  ;;  %v265_v62 = vrot.slane %v264_v52, 2 }
 0x1d9   :  { %v231_v13 = vadd.f32 %v230_v56, %v209_v60  ;;  %v240_v46 = vadd.f32 %v239_v57, %v210_v61  ;;  %v271_v63 = vmax.f32 %v270_v58, %v209_v60  ;;  %v280_v3 = vmax.f32 %v279_v59, %v210_v61 }
 0x1da   :  { %v217_v7 = vadd.f32 %v216_v55, %v215_v6  ;;  %v226_v10 = vadd.f32 %v225_v1, %v224_v50  ;;  %v257_v23 = vmax.f32 %v255_v51, %v256_v12  ;;  %v266_v24 = vmax.f32 %v264_v52, %v265_v62 }
 0x1db   :  { %v232_v11 = vrot.slane %v231_v13, 4  ;;  %v241_v16 = vrot.slane %v240_v46, 4  ;;  %v272_v17 = vrot.slane %v271_v63, 4  ;;  %v281_v22 = vrot.slane %v280_v3, 4 }
 0x1dc   :  { %v218_v28 = vrot.slane %v217_v7, 1  ;;  %v227_v19 = vrot.slane %v226_v10, 1  ;;  %v267_v33 = vrot.slane %v266_v24, 1  ;;  %v258_v34 = vrot.slane %v257_v23, 1 }
 0x1dd   :  { %v233_v25 = vadd.f32 %v232_v11, %v231_v13  ;;  %v242_v26 = vadd.f32 %v241_v16, %v240_v46  ;;  %v273_v27 = vmax.f32 %v271_v63, %v272_v17  ;;  %v282_v18 = vmax.f32 %v280_v3, %v281_v22 }
 0x1de   :  { %v228_v37 = vadd.f32 %v227_v19, %v226_v10  ;;  %v219_v8 = vadd.f32 %v218_v28, %v217_v7  ;;  %v268_v39 = vmax.f32 %v266_v24, %v267_v33  ;;  %v259_v40 = vmax.f32 %v257_v23, %v258_v34 }
 0x1df   :  { %v234_v29 = vrot.slane %v233_v25, 2  ;;  %v243_v30 = vrot.slane %v242_v26, 2  ;;  %v274_v31 = vrot.slane %v273_v27, 2  ;;  %v283_v32 = vrot.slane %v282_v18, 2 }
 0x1e0   :  { %v248_v44 = vmul.f32 0.03125, %v228_v37  ;;  %v247_v21 = vmul.f32 0.03125, %v219_v8 }
 0x1e1   :  { %v235_v35 = vadd.f32 %v234_v29, %v233_v25  ;;  %v244_v2 = vadd.f32 %v243_v30, %v242_v26  ;;  %v275_v36 = vmax.f32 %v273_v27, %v274_v31  ;;  %v284_v4 = vmax.f32 %v282_v18, %v283_v32 }
 0x1e3   :  { %v236_v9 = vrot.slane %v235_v35, 1  ;;  %v285_v14 = vrot.slane %v284_v4, 1  ;;  %v276_v38 = vrot.slane %v275_v36, 1  ;;  %v245_v15 = vrot.slane %v244_v2, 1 }
 0x1e5   :  { %v286_v41 = vmax.f32 %v284_v4, %v285_v14  ;;  %v277_v42 = vmax.f32 %v275_v36, %v276_v38  ;;  %v246_v43 = vadd.f32 %v245_v15, %v244_v2  ;;  %v237_v20 = vadd.f32 %v236_v9, %v235_v35 }
 0x1e7   :  { %v421_v45 = vsel %vm419_vm2, %v286_v41, %v268_v39  ;;  %v420_v47 = vsel %vm419_vm2, %v277_v42, %v259_v40  ;;  %v250_v48 = vmul.f32 0.03125, %v246_v43  ;;  %v249_v49 = vmul.f32 0.03125, %v237_v20 }
 0x1e8   :  { %488 = vmatprep.mubr.f32.mxu1 %v421_v45 }
 0x1e9   :  { %489 = vmatmul.mubr.f32.vlgmr.msra.gmra.mrb[0].mxu1 %v420_v47  ;;  %v500_v5 = vsel %vm419_vm2, %v250_v48, %v248_v44  ;;  %v499_v6 = vsel %vm419_vm2, %v249_v49, %v247_v21 }
 0x1ea   :  { %567 = vmatprep.mubr.f32.mxu0 %v500_v5 }
 0x1eb   :  { %568 = vmatmul.mubr.f32.vlgmr.msra.gmra.mrb[0].mxu0 %v499_v6 }
 0x2bc   :  { %v490_v50 = vpop.f32.mrb[0].mxu1 }
 0x2bd   :  { %v492_v51 = vpop.f32.mrb[1].mxu1 }
 0x2be   :  { %v569_v52 = vpop.f32.mrb[0].mxu0 }
 0x2bf   :  { %v570_v53 = vadd.f32 %v569_v52, %v490_v50  ;;  %v571_v54 = vpop.f32.mrb[1].mxu0 }
 0x2c0   :  { %v572_v0 = vadd.f32 %v571_v54, %v492_v51 }
 0x2c1   :  { %v607_v55 = vmul.f32 -1.442695, %v570_v53 }
 0x2c2   :  { %v608_v1 = vmul.f32 -1.442695, %v572_v0 }
 0x2c3   :  { %748 = vpow2.f32 %v607_v55 }
 0x2c4   :  { %750 = vpow2.f32 %v608_v1 }
 0x2cd   :  { %v749_v56 = vpop.eup %748 }
 0x2ce   :  { %v751_v57 = vpop.eup %750  ;;  %v580_v58 = vadd.f32 1.0, %v749_v56 }
 0x2cf   :  { %v581_v59 = vadd.f32 1.0, %v751_v57 }
 0x2d0   :  { %752 = vrcp.f32 %v580_v58 }
 0x2d1   :  { %754 = vrcp.f32 %v581_v59 }
 0x2da   :  { %v753_v60 = vpop.eup %752 }
 0x2db   :  { %v755_v61 = vpop.eup %754  ;;  %v586_v12 = vmul.f32 %v753_v60, %v570_v53 }
 0x2dc   :  { %v587_v62 = vmul.f32 %v755_v61, %v572_v0 }
 0x2de   :  { %v590_v13 = vcombine.low %v586_v12, %v587_v62 }
 0x2e0   :  { %609 = vst.sshfl [vmem:[%s1328_s6] sm:$0x33 pattern:$0x76325410] %v590_v13 }

</bundles_post_ra>
